<compile_context>
chip_gen: v5e
topology: v5e:2x2
jax: 0.10.0
libtpu: 0.0.40
codegen_flags: <defaults>
</compile_context>

<pallas_src>
import jax
import jax.numpy as jnp
from jax.experimental import pallas as pl
from jax.experimental.pallas import tpu as pltpu


_PER_BUFFER_BYTES = 12 * 1024 * 1024   # x-tile bytes per pipeline buffer
_VMEM_LIMIT_BYTES = 48 * 1024 * 1024   # < v7x 64 MiB physical; ample on v5e/v6e


def _round_up(x, m):
    return ((x + m - 1) // m) * m


def _round_down(x, m):
    return (x // m) * m


# --------------------------------------------------------------------------
# Fast path: 128 % D == 0  ->  lane-dense rows of 128//D batch elements each.
# --------------------------------------------------------------------------

def _dense_kernel(x_ref, w_ref, b_ref, o_ref):
    # x_ref: (TR, 128) lane-dense tile (each row packs 128//D batch elements)
    # w_ref: (128, r)  block-diagonal weight (resident across all grid steps)
    # b_ref: (1,)      f32 bias scalar in SMEM
    # o_ref: (TR, r)   sigmoid outputs
    z = jnp.dot(x_ref[...], w_ref[...],
                preferred_element_type=jnp.float32,
                precision=jax.lax.Precision.HIGHEST) + b_ref[0]
    o_ref[...] = (1.0 / (1.0 + jnp.exp(-z))).astype(o_ref.dtype)


def _dense_forward(x, w, b):
    B, D = x.shape
    r = 128 // D                 # batch elements packed per 128-lane row
    rows = B // r

    x2 = x.reshape(rows, 128)    # contiguous row-major reshape: no data movement

    # Block-diagonal weight: W2[l, j] = w[l % D] if l // D == j else 0.
    lane = jnp.arange(128)
    seg_mask = (lane[:, None] // D == jnp.arange(r)[None, :]).astype(x.dtype)
    w2 = seg_mask * jnp.tile(w.reshape(-1), r).astype(x.dtype)[:, None]   # (128, r)

    # Row-tile sizing: the 128 lanes are already dense, so bytes/row = 128*itemsize.
    tr = _round_down(_PER_BUFFER_BYTES // (128 * x.dtype.itemsize), 16)
    tr = max(16, tr)
    # Keep >= 4 grid steps when the batch is big enough (v7x has 2 TensorCores).
    tr = min(tr, max(16, _round_up(pl.cdiv(rows, 4), 16)))
    if rows <= tr:
        tr = rows                # single full-extent block

    grid = (pl.cdiv(rows, tr),)  # ragged last block is padded/masked by Pallas

    out = pl.pallas_call(
        _dense_kernel,
        out_shape=jax.ShapeDtypeStruct((rows, r), x.dtype),
        grid=grid,
        in_specs=[
            pl.BlockSpec((tr, 128), lambda i: (i, 0)),            # streamed x tiles
            pl.BlockSpec((128, r), lambda i: (0, 0)),             # resident weight
            pl.BlockSpec(memory_space=pltpu.MemorySpace.SMEM),    # bias scalar
        ],
        out_specs=pl.BlockSpec((tr, r), lambda i: (i, 0)),
        compiler_params=pltpu.CompilerParams(
            dimension_semantics=("parallel",),
            vmem_limit_bytes=_VMEM_LIMIT_BYTES,
        ),
    )(x2, w2, b)

    return out.reshape(B, 1)


# --------------------------------------------------------------------------
# General path: any B, any D (optionally tiling D on an "arbitrary" axis).
# --------------------------------------------------------------------------

def _general_kernel(x_ref, w_ref, b_ref, o_ref, acc_ref):
    k = pl.program_id(1)

    @pl.when(k == 0)
    def _():
        acc_ref[...] = jnp.zeros_like(acc_ref)

    acc_ref[...] += jnp.dot(x_ref[...], w_ref[...],
                            preferred_element_type=jnp.float32,
                            precision=jax.lax.Precision.HIGHEST)

    @pl.when(k == pl.num_programs(1) - 1)
    def _():
        z = acc_ref[...] + b_ref[0]
        o_ref[...] = (1.0 / (1.0 + jnp.exp(-z))).astype(o_ref.dtype)


def _general_forward(x, w, b):
    B, D = x.shape
    d_pad = 128 * pl.cdiv(D, 128)       # VMEM holds tiles lane-padded to 128
    w_col = w.reshape(D, 1).astype(x.dtype)

    tb = _round_down(_PER_BUFFER_BYTES // (d_pad * x.dtype.itemsize), 16)
    if tb >= 16:
        td = D                           # whole feature dim per block
        tb = min(tb, max(16, _round_up(pl.cdiv(B, 4), 16)))
        if B <= tb:
            tb = B
    else:
        # Huge D: tile the feature dim along an "arbitrary" reduction axis.
        tb = 16 if B >= 16 else B
        td = D
        for cand in (16384, 8192, 4096, 2048, 1024, 512, 256, 128):
            if D % cand == 0:
                td = cand
                break
        # TODO(synk): a D too large for one block and not a multiple of 128
        # keeps a single oversized K block (masked K-tiling not implemented).

    grid = (pl.cdiv(B, tb), pl.cdiv(D, td))

    return pl.pallas_call(
        _general_kernel,
        out_shape=jax.ShapeDtypeStruct((B, 1), x.dtype),
        grid=grid,
        in_specs=[
            pl.BlockSpec((tb, td), lambda i, k: (i, k)),           # x tiles
            pl.BlockSpec((td, 1), lambda i, k: (k, 0)),            # weight column
            pl.BlockSpec(memory_space=pltpu.MemorySpace.SMEM),     # bias scalar
        ],
        out_specs=pl.BlockSpec((tb, 1), lambda i, k: (i, 0)),
        scratch_shapes=[pltpu.VMEM((tb, 1), jnp.float32)],
        compiler_params=pltpu.CompilerParams(
            dimension_semantics=("parallel", "arbitrary"),
            vmem_limit_bytes=_VMEM_LIMIT_BYTES,
        ),
    )(x, w_col, b)


# --------------------------------------------------------------------------
# Public wrapper (matches SimpleModel.forward semantics).
# --------------------------------------------------------------------------

def simple_model_forward(x, w, b):
    """x: (B, D), w: (1, D) (nn.Linear layout), b: (1,)  ->  (B, 1) sigmoid(x @ w.T + b)."""
    B, D = x.shape
    if x.dtype != jnp.float32 and x.dtype != jnp.bfloat16:
        x = x.astype(jnp.float32)
    w = jnp.asarray(w).reshape(1, D)
    b = jnp.asarray(b).reshape(1).astype(jnp.float32)

    if D <= 128 and 128 % D == 0 and B % (128 // D) == 0:
        return _dense_forward(x, w, b)
    return _general_forward(x, w, b)


if __name__ == "__main__":
    key = jax.random.PRNGKey(0)
    k_x, k_w, k_b = jax.random.split(key, 3)

    batch = 8
    input_size = 32

    # Mimic nn.Linear's uniform(-1/sqrt(fan_in), 1/sqrt(fan_in)) init.
    bound = 1.0 / (input_size ** 0.5)
    x = jax.random.normal(k_x, (batch, input_size), dtype=jnp.float32)
    w = jax.random.uniform(k_w, (1, input_size), dtype=jnp.float32,
                           minval=-bound, maxval=bound)
    b = jax.random.uniform(k_b, (1,), dtype=jnp.float32,
                           minval=-bound, maxval=bound)

    out = simple_model_forward(x, w, b)
    jax.block_until_ready(out)

    # Exact-precision reference; tolerance is tight now that the kernel uses
    # an exact sigmoid and full-precision accumulation.
    ref = jax.nn.sigmoid(
        jnp.dot(x, w.T, precision=jax.lax.Precision.HIGHEST) + b)
    assert out.shape == (batch, 1)
    err = float(jnp.max(jnp.abs(out - ref)))
    assert jnp.allclose(out, ref, atol=1e-4, rtol=1e-4), err

    print("KERNEL_OK")
</pallas_src>

<mosaic_0001>
module attributes {stable_mosaic.version = 11 : i64} {
  func.func @_dense_kernel(%arg0: i32, %arg1: memref<2x128xf32, #tpu.memory_space<vmem>>, %arg2: memref<128x4xf32, #tpu.memory_space<vmem>>, %arg3: memref<1xf32, #tpu.memory_space<smem>>, %arg4: memref<2x4xf32, #tpu.memory_space<vmem>>) attributes {dimension_semantics = [#tpu.dimension_semantics<parallel>], iteration_bounds = array<i64: 1>, scalar_prefetch = 0 : i64, scratch_operands = 0 : i64, tpu.core_type = #tpu.core_type<tc>, window_params = [{transform_indices = @transform_0, window_bounds = array<i64: 2, 128>}, {pipeline_mode = #tpu.pipeline_mode<synchronous>, transform_indices = @transform_1, window_bounds = array<i64: 128, 4>}, {transform_indices = @transform_2, window_bounds = array<i64: 1>}, {transform_indices = @transform_3, window_bounds = array<i64: 2, 4>}]} {
    %c0 = arith.constant 0 : index
    %c0_0 = arith.constant 0 : index
    %0 = vector.load %arg1[%c0, %c0_0] : memref<2x128xf32, #tpu.memory_space<vmem>>, vector<2x128xf32>
    %c0_1 = arith.constant 0 : index
    %c0_2 = arith.constant 0 : index
    %1 = vector.load %arg2[%c0_1, %c0_2] : memref<128x4xf32, #tpu.memory_space<vmem>>, vector<128x4xf32>
    %cst = arith.constant dense<0.000000e+00> : vector<2x4xf32>
    %2 = tpu.matmul %0, %1, %cst {dimension_numbers = #tpu.dot_dimension_numbers<[1], [0], [0], [1], [0, 0, 1, 1], [], []>, precision = #tpu.contract_precision<fp32>} : vector<2x128xf32>, vector<128x4xf32>, vector<2x4xf32> -> vector<2x4xf32>
    %c0_3 = arith.constant 0 : index
    %3 = memref.load %arg3[%c0_3] : memref<1xf32, #tpu.memory_space<smem>>
    %4 = vector.broadcast %3 : f32 to vector<2x4xf32>
    %5 = arith.addf %2, %4 : vector<2x4xf32>
    %cst_4 = arith.constant 0.000000e+00 : f32
    %6 = vector.broadcast %cst_4 : f32 to vector<2x4xf32>
    %7 = arith.subf %6, %5 : vector<2x4xf32>
    %8 = math.exp %7 : vector<2x4xf32>
    %cst_5 = arith.constant 1.000000e+00 : f32
    %9 = vector.broadcast %cst_5 : f32 to vector<2x4xf32>
    %10 = arith.addf %9, %8 : vector<2x4xf32>
    %cst_6 = arith.constant 1.000000e+00 : f32
    %11 = vector.broadcast %cst_6 : f32 to vector<2x4xf32>
    %12 = arith.divf %11, %10 : vector<2x4xf32>
    %c0_7 = arith.constant 0 : index
    %c0_8 = arith.constant 0 : index
    %13 = vector.load %arg4[%c0_7, %c0_8] : memref<2x4xf32, #tpu.memory_space<vmem>>, vector<2x4xf32>
    tpu.vector_store %arg4[%c0_7, %c0_8], %12 {strides = array<i32>} : memref<2x4xf32, #tpu.memory_space<vmem>>, vector<2x4xf32>,
    return
  }
  func.func @transform_0(%arg0: i32) -> (i32, i32) {
    %c0_i32 = arith.constant 0 : i32
    %c0_i32_0 = arith.constant 0 : i32
    return %arg0, %c0_i32 : i32, i32
  }
  func.func @transform_1(%arg0: i32) -> (i32, i32) {
    %c0_i32 = arith.constant 0 : i32
    %c0_i32_0 = arith.constant 0 : i32
    %c0_i32_1 = arith.constant 0 : i32
    return %c0_i32, %c0_i32_0 : i32, i32
  }
  func.func @transform_2(%arg0: i32) -> i32 {
    %c0_i32 = arith.constant 0 : i32
    %c0_i32_0 = arith.constant 0 : i32
    return %c0_i32 : i32
  }
  func.func @transform_3(%arg0: i32) -> (i32, i32) {
    %c0_i32 = arith.constant 0 : i32
    %c0_i32_0 = arith.constant 0 : i32
    return %arg0, %c0_i32 : i32, i32
  }
}

</mosaic_0001>

<bundles_post_ra>
// kernel: tpu_custom_call.1
= control target key start
LH: loop header
LB: loop body
LE: loop exit
PB: predicated region body
PF: predicated region fallthrough
CT: control target
= control target key end

     0   :  { %s760_s0 = inlined_call_operand.vmem [shape: f32[2,128], index: 0, kind: input, shape index: {}]   ;;  %s761_s1 = inlined_call_operand.vmem [shape: f32[128,4], index: 1, kind: input, shape index: {}]   ;;  %s762_s2 = inlined_call_operand.<no memory space> [shape: f32[1], index: 2, kind: input, shape index: {}]   ;;  %s763_s3 = inlined_call_operand.hbm [shape: f32[2,4], index: 3, kind: output, shape index: {}]  }
   0x1   :  { %v32_v0 = vld [vmem:[%s761_s1 + $0x78] sm:$0xff]  ;;  %v31_v1 = vld [vmem:[%s761_s1 + $0x70] sm:$0xff]  ;;  %v30_v2 = vld [vmem:[%s761_s1 + $0x68] sm:$0xff] }
   0x2   :  { %v474_v3 = vand.u32 4294901760, %v32_v0  ;;  %v476_v4 = vand.u32 4294901760, %v31_v1  ;;  %v478_v5 = vand.u32 4294901760, %v30_v2  ;;  %v29_v6 = vld [vmem:[%s761_s1 + $0x60] sm:$0xff]  ;;  %v28_v7 = vld [vmem:[%s761_s1 + $0x58] sm:$0xff]  ;;  %v27_v8 = vld [vmem:[%s761_s1 + $0x50] sm:$0xff] }
   0x3   :  { %v489_v9 = vand.u32 4294901760, %v29_v6  ;;  %v491_v10 = vand.u32 4294901760, %v28_v7  ;;  %v493_v11 = vand.u32 4294901760, %v27_v8  ;;  %v26_v12 = vld [vmem:[%s761_s1 + $0x48] sm:$0xff]  ;;  %v25_v13 = vld [vmem:[%s761_s1 + $0x40] sm:$0xff]  ;;  %v24_v21 = vld [vmem:[%s761_s1 + $0x38] sm:$0xff] }
   0x4   :  { %36 = vmatpush.msra.mxu0 %v474_v3  ;;  %v503_v14 = vsub.f32 %v32_v0, %v474_v3  ;;  %v506_v15 = vsub.f32 %v31_v1, %v476_v4  ;;  %v509_v16 = vsub.f32 %v30_v2, %v478_v5  ;;  %v511_v17 = vand.u32 4294901760, %v26_v12  ;;  %232 = vmatpush.msra.mxu3 %v474_v3 }
   0x5   :  { %v515_v18 = vsub.f32 %v29_v6, %v489_v9  ;;  %v518_v19 = vsub.f32 %v28_v7, %v491_v10  ;;  %v520_v20 = vand.u32 4294901760, %v25_v13  ;;  %v530_v25 = vsub.f32 %v27_v8, %v493_v11 }
   0x6   :  { %38 = vmatpush.msra.mxu0 %v476_v4  ;;  %v78_v22 = vand.u32 4294901760, %v503_v14  ;;  %v84_v23 = vand.u32 4294901760, %v506_v15  ;;  %v90_v24 = vand.u32 4294901760, %v509_v16  ;;  %179 = vmatpush.msra.mxu2 %v503_v14 }
   0x7   :  { %9 = vsyncpa [#allocation4], 0  ;;  %v96_v26 = vand.u32 4294901760, %v515_v18  ;;  %v102_v27 = vand.u32 4294901760, %v518_v19  ;;  %v536_v28 = vsub.f32 %v26_v12, %v511_v17  ;;  %234 = vmatpush.msra.mxu3 %v476_v4  ;;  %v549_v32 = vand.u32 4294901760, %v24_v21  ;;  %v23_v34 = vld [vmem:[%s761_s1 + $0x30] sm:$0xff] }
   0x8   :  { %v79_v29 = vsub.f32 %v503_v14, %v78_v22  ;;  %40 = vmatpush.msra.mxu0 %v478_v5  ;;  %v85_v30 = vsub.f32 %v506_v15, %v84_v23  ;;  %v91_v31 = vsub.f32 %v509_v16, %v90_v24  ;;  %182 = vmatpush.msra.mxu2 %v506_v15  ;;  %v22_v35 = vld [vmem:[%s761_s1 + $0x28] sm:$0xff]  ;;  %v108_v39 = vand.u32 4294901760, %v530_v25  ;;  %v21_v42 = vld [vmem:[%s761_s1 + $0x20] sm:$0xff]  ;;  %v20_v47 = vld [vmem:[%s761_s1 + $0x18] sm:$0xff]  ;;  %s404_s22 = sshll.u32 %s763_s3, 4  ;;  %s405_s22 = int_to_ptr.hbm [resolvable:$true] %s404_s22 }
   0x9   :  { %v553_v33 = vsub.f32 %v25_v13, %v520_v20  ;;  %236 = vmatpush.msra.mxu3 %v478_v5  ;;  %v97_v38 = vsub.f32 %v515_v18, %v96_v26  ;;  %v103_v40 = vsub.f32 %v518_v19, %v102_v27  ;;  %v114_v41 = vand.u32 4294901760, %v536_v28  ;;  %v19_v53 = vld [vmem:[%s761_s1 + $0x10] sm:$0xff]  ;;  %v18_v61 = vld [vmem:[%s761_s1 + $0x8] sm:$0xff]  ;;  %v17_v2 = vld [vmem:[%s761_s1] sm:$0xff] }
   0xa   :  { %v80_v36 = vand.u32 4294901760, %v79_v29  ;;  %v86_v37 = vand.u32 4294901760, %v85_v30  ;;  %42 = vmatpush.msra.mxu0 %v489_v9  ;;  %185 = vmatpush.msra.mxu2 %v509_v16  ;;  %v92_v43 = vand.u32 4294901760, %v91_v31  ;;  %v577_v44 = vand.u32 4294901760, %v23_v34  ;;  %v16_v29 = vld [vmem:[%s760_s0] sm:$0x3] }
   0xb   :  { %238 = vmatpush.msra.mxu3 %v489_v9  ;;  %v580_v45 = vsub.f32 %v24_v21, %v549_v32  ;;  %v582_v46 = vand.u32 4294901760, %v22_v35  ;;  %v120_v48 = vand.u32 4294901760, %v553_v33  ;;  %v98_v49 = vand.u32 4294901760, %v97_v38 }
   0xc   :  { %81 = vmatpush.msra.mxu1 %v80_v36  ;;  %44 = vmatpush.msra.mxu0 %v491_v10  ;;  %v109_v50 = vsub.f32 %v530_v25, %v108_v39  ;;  %v595_v51 = vsub.f32 %v23_v34, %v577_v44  ;;  %v597_v52 = vand.u32 4294901760, %v21_v42  ;;  %v602_v54 = vand.u32 4294901760, %v20_v47 }
   0xd   :  { %188 = vmatpush.msra.mxu2 %v515_v18  ;;  %240 = vmatpush.msra.mxu3 %v491_v10  ;;  %v104_v55 = vand.u32 4294901760, %v103_v40  ;;  %v115_v56 = vsub.f32 %v536_v28, %v114_v41  ;;  %v126_v57 = vand.u32 4294901760, %v580_v45  ;;  %v612_v58 = vsub.f32 %v22_v35, %v582_v46 }
   0xe   :  { %87 = vmatpush.msra.mxu1 %v86_v37  ;;  %46 = vmatpush.msra.mxu0 %v493_v11  ;;  %v121_v59 = vsub.f32 %v553_v33, %v120_v48  ;;  %v617_v60 = vand.u32 4294901760, %v19_v53  ;;  %v110_v62 = vand.u32 4294901760, %v109_v50  ;;  %v132_v63 = vand.u32 4294901760, %v595_v51 }
   0xf   :  { %191 = vmatpush.msra.mxu2 %v518_v19  ;;  %242 = vmatpush.msra.mxu3 %v493_v11  ;;  %v627_v0 = vsub.f32 %v21_v42, %v597_v52  ;;  %v630_v1 = vsub.f32 %v20_v47, %v602_v54  ;;  %v116_v6 = vand.u32 4294901760, %v115_v56  ;;  %v127_v7 = vsub.f32 %v580_v45, %v126_v57 }
  0x10   :  { %93 = vmatpush.msra.mxu1 %v92_v43  ;;  %48 = vmatpush.msra.mxu0 %v511_v17  ;;  %v138_v8 = vand.u32 4294901760, %v612_v58  ;;  %v642_v12 = vand.u32 4294901760, %v18_v61  ;;  %v122_v13 = vand.u32 4294901760, %v121_v59  ;;  %v645_v21 = vsub.f32 %v19_v53, %v617_v60 }
  0x11   :  { %194 = vmatpush.msra.mxu2 %v530_v25  ;;  %244 = vmatpush.msra.mxu3 %v511_v17  ;;  %v133_v30 = vsub.f32 %v595_v51, %v132_v63  ;;  %v144_v31 = vand.u32 4294901760, %v627_v0  ;;  %v657_v34 = vand.u32 4294901760, %v17_v2  ;;  %v659_v35 = vand.u32 4294901760, %v16_v29 }
  0x12   :  { %99 = vmatpush.msra.mxu1 %v98_v49  ;;  %50 = vmatpush.msra.mxu0 %v520_v20  ;;  %v150_v36 = vand.u32 4294901760, %v630_v1  ;;  %v128_v37 = vand.u32 4294901760, %v127_v7  ;;  %v139_v38 = vsub.f32 %v612_v58, %v138_v8  ;;  %v669_v40 = vsub.f32 %v18_v61, %v642_v12 }
  0x13   :  { %197 = vmatpush.msra.mxu2 %v536_v28  ;;  %246 = vmatpush.msra.mxu3 %v520_v20  ;;  %v68_v42 = vsub.f32 %v16_v29, %v659_v35  ;;  %v134_v43 = vand.u32 4294901760, %v133_v30  ;;  %v145_v47 = vsub.f32 %v627_v0, %v144_v31  ;;  %v156_v49 = vand.u32 4294901760, %v645_v21 }
  0x14   :  { %105 = vmatpush.msra.mxu1 %v104_v55  ;;  %52 = vmatpush.msra.mxu0 %v549_v32  ;;  %v680_v50 = vsub.f32 %v17_v2, %v657_v34  ;;  %v140_v53 = vand.u32 4294901760, %v139_v38  ;;  %v151_v55 = vsub.f32 %v630_v1, %v150_v36  ;;  %v162_v56 = vand.u32 4294901760, %v669_v40 }
  0x15   :  { %200 = vmatpush.msra.mxu2 %v553_v33  ;;  %248 = vmatpush.msra.mxu3 %v549_v32  ;;  %v69_v59 = vand.u32 4294901760, %v68_v42  ;;  %v146_v61 = vand.u32 4294901760, %v145_v47  ;;  %vm395_vm3 = vcmask 25600  }
  0x16   :  { %111 = vmatpush.msra.mxu1 %v110_v62  ;;  %54 = vmatpush.msra.mxu0 %v577_v44  ;;  %v157_v62 = vsub.f32 %v645_v21, %v156_v49  ;;  %v168_v2 = vand.u32 4294901760, %v680_v50  ;;  %v163_v7 = vsub.f32 %v669_v40, %v162_v56 }
  0x17   :  { %203 = vmatpush.msra.mxu2 %v580_v45  ;;  %250 = vmatpush.msra.mxu3 %v577_v44 }
  0x18   :  { %117 = vmatpush.msra.mxu1 %v116_v6  ;;  %56 = vmatpush.msra.mxu0 %v582_v46  ;;  %v152_v6 = vand.u32 4294901760, %v151_v55  ;;  %v158_v29 = vand.u32 4294901760, %v157_v62  ;;  %v169_v30 = vsub.f32 %v680_v50, %v168_v2 }
  0x19   :  { %206 = vmatpush.msra.mxu2 %v595_v51  ;;  %252 = vmatpush.msra.mxu3 %v582_v46 }
  0x1a   :  { %123 = vmatpush.msra.mxu1 %v122_v13  ;;  %58 = vmatpush.msra.mxu0 %v597_v52  ;;  %v70_v13 = vsub.f32 %v68_v42, %v69_v59 }
  0x1b   :  { %209 = vmatpush.msra.mxu2 %v612_v58  ;;  %254 = vmatpush.msra.mxu3 %v597_v52 }
  0x1c   :  { %129 = vmatpush.msra.mxu1 %v128_v37  ;;  %60 = vmatpush.msra.mxu0 %v602_v54  ;;  %v164_v37 = vand.u32 4294901760, %v163_v7  ;;  %v71_v38 = vand.u32 4294901760, %v70_v13 }
  0x1d   :  { %212 = vmatpush.msra.mxu2 %v627_v0  ;;  %256 = vmatpush.msra.mxu3 %v602_v54 }
  0x1e   :  { %135 = vmatpush.msra.mxu1 %v134_v43  ;;  %62 = vmatpush.msra.mxu0 %v617_v60  ;;  %v170_v43 = vand.u32 4294901760, %v169_v30 }
  0x1f   :  { %215 = vmatpush.msra.mxu2 %v630_v1  ;;  %258 = vmatpush.msra.mxu3 %v617_v60 }
  0x20   :  { %141 = vmatpush.msra.mxu1 %v140_v53  ;;  %64 = vmatpush.msra.mxu0 %v642_v12 }
  0x21   :  { %218 = vmatpush.msra.mxu2 %v645_v21  ;;  %260 = vmatpush.msra.mxu3 %v642_v12 }
  0x22   :  { %147 = vmatpush.msra.mxu1 %v146_v61  ;;  %66 = vmatpush.msra.mxu0 %v657_v34 }
  0x23   :  { %221 = vmatpush.msra.mxu2 %v669_v40  ;;  %262 = vmatpush.msra.mxu3 %v657_v34 }
  0x24   :  { %273 = vmatpush.msrb.mxu0 %v78_v22  ;;  %153 = vmatpush.msra.mxu1 %v152_v6 }
  0x25   :  { %224 = vmatpush.msra.mxu2 %v680_v50  ;;  %266 = vmatmul.f32.vlgmr.msra.gmra.mxu3 %v69_v59 }
  0x26   :  { %277 = vmatpush.msrb.mxu0 %v84_v23  ;;  %159 = vmatpush.msra.mxu1 %v158_v29 }
  0x27   :  { %227 = vmatmul.f32.vlgmr.msra.gmra.mxu2 %v68_v42  ;;  %72 = vmatmul.f32.vlgmr.msra.gmra.mxu0 %v71_v38 }
  0x28   :  { %281 = vmatpush.msrb.mxu0 %v90_v24  ;;  %165 = vmatpush.msra.mxu1 %v164_v37 }
  0x2a   :  { %285 = vmatpush.msrb.mxu0 %v96_v26  ;;  %171 = vmatpush.msra.mxu1 %v170_v43 }
  0x2b   :  { %173 = vmatmul.f32.vlgmr.msra.gmra.mxu1 %v659_v35 }
  0x2c   :  { %340 = vmatpush.msrb.mxu1 %v474_v3  ;;  %289 = vmatpush.msrb.mxu0 %v102_v27  ;;  %v34_v3 = vstv %s762_s2  ;;  %s444_s2 = smov [#allocation3]  }
  0x2d   :  { %s402_s19 = sshll.u32 %s444_s2, 4  ;;  %s403_s19 = int_to_ptr.vmem [resolvable:$true] %s402_s19 }
  0x2e   :  { %342 = vmatpush.msrb.mxu1 %v476_v4  ;;  %293 = vmatpush.msrb.mxu0 %v108_v39 }
  0x30   :  { %344 = vmatpush.msrb.mxu1 %v478_v5  ;;  %297 = vmatpush.msrb.mxu0 %v114_v41 }
  0x32   :  { %346 = vmatpush.msrb.mxu1 %v489_v9  ;;  %301 = vmatpush.msrb.mxu0 %v120_v48 }
  0x34   :  { %348 = vmatpush.msrb.mxu1 %v491_v10  ;;  %305 = vmatpush.msrb.mxu0 %v126_v57 }
  0x36   :  { %350 = vmatpush.msrb.mxu1 %v493_v11  ;;  %309 = vmatpush.msrb.mxu0 %v132_v63 }
  0x38   :  { %352 = vmatpush.msrb.mxu1 %v511_v17  ;;  %313 = vmatpush.msrb.mxu0 %v138_v8 }
  0x3a   :  { %354 = vmatpush.msrb.mxu1 %v520_v20  ;;  %317 = vmatpush.msrb.mxu0 %v144_v31 }
  0x3c   :  { %356 = vmatpush.msrb.mxu1 %v549_v32  ;;  %321 = vmatpush.msrb.mxu0 %v150_v36 }
  0x3e   :  { %358 = vmatpush.msrb.mxu1 %v577_v44  ;;  %325 = vmatpush.msrb.mxu0 %v156_v49 }
  0x40   :  { %360 = vmatpush.msrb.mxu1 %v582_v46  ;;  %329 = vmatpush.msrb.mxu0 %v162_v56 }
  0x42   :  { %362 = vmatpush.msrb.mxu1 %v597_v52  ;;  %333 = vmatpush.msrb.mxu0 %v168_v2 }
  0x43   :  { %335 = vmatmul.f32.vlgmr.msrb.gmra.mxu0 %v659_v35 }
  0x44   :  { %364 = vmatpush.msrb.mxu1 %v602_v54 }
  0x46   :  { %366 = vmatpush.msrb.mxu1 %v617_v60 }
  0x48   :  { %368 = vmatpush.msrb.mxu1 %v642_v12 }
  0x4a   :  { %370 = vmatpush.msrb.mxu1 %v657_v34 }
  0x4b   :  { %372 = vmatmul.f32.vlgmr.msrb.gmra.mxu1 %v659_v35 }
  0xa4   :  { %v73_v4 = vpop.f32.mrf.mxu0 }
  0xa5   :  { %v74_v5 = vadd.f32 %v73_v4, %v34_v3 }
  0xa8   :  { %v174_v9 = vpop.f32.mrf.mxu1  ;;  %v267_v15 = vpop.f32.mrf.mxu3 }
  0xa9   :  { %v175_v10 = vadd.f32 %v174_v9, %v74_v5 }
  0xaa   :  { %v228_v11 = vpop.f32.mrf.mxu2 }
  0xab   :  { %v229_v14 = vadd.f32 %v228_v11, %v175_v10 }
  0xad   :  { %v268_v16 = vadd.f32 %v267_v15, %v229_v14 }
  0xc0   :  { %v336_v17 = vpop.f32.mrf.mxu0 }
  0xc1   :  { %v337_v18 = vadd.f32 %v336_v17, %v268_v16 }
  0xc8   :  { %v373_v19 = vpop.f32.mrf.mxu1 }
  0xc9   :  { %v374_v20 = vadd.f32 %v373_v19, %v337_v18 }
  0xcb   :  { %v376_v22 = vsub.f32 0.0, %v374_v20 }
  0xcd   :  { %v377_v23 = vmul.f32 1.442695, %v376_v22 }
  0xcf   :  { %414 = vpow2.f32 %v377_v23 }
  0xd5   :  { %v415_v24 = vpop.eup %414 }
  0xd6   :  { %v379_v25 = vadd.f32 1.0, %v415_v24 }
  0xd8   :  { %416 = vrcp.f32 %v379_v25  ;;  %v391_v32 = vand.u32 2147483648, %v379_v25  ;;  %v389_v39 = vand.u32 2147483647, %v379_v25  ;;  %vm385_vm1 = vweird.f32 %v379_v25 }
  0xda   :  { %v392_v44 = vor.u32 1.1754944e-38, %v391_v32  ;;  %vm390_vm4 = vcmp.eq.f32.partialorder %v389_v39, 8.507059e+37 }
  0xde   :  { %v417_v26 = vpop.eup %416 }
  0xdf   :  { %v381_v27 = vmul.f32 %v417_v26, %v379_v25  ;;  %vm386_vm0 = vweird.f32 %v417_v26 }
  0xe0   :  { %vm387_vm2 = vmor %vm385_vm1, %vm386_vm0 }
  0xe1   :  { %v382_v28 = vsub.f32 1.0, %v381_v27 }
  0xe3   :  { %v383_v33 = vmul.f32 %v417_v26, %v382_v28 }
  0xe5   :  { %v384_v41 = vadd.f32 %v417_v26, %v383_v33 }
  0xe7   :  { %v388_v45 = vsel %vm387_vm2, %v417_v26, %v384_v41 }
  0xe8   :  { %v393_v46 = vsel %vm390_vm4, %v392_v44, %v388_v45 }
  0xe9   :  { %396 = vst.msk [vmem:[#allocation3] sm:$0x3] %vm395_vm3, %v393_v46 }
  0xea   :  { %407 = dma.vmem_to_hbm [thread:$0]  %s403_s19, 32, %s405_s22, [#allocation4]  }
  0xeb   :  { %442 = dma.done.wait [#allocation4], 32  }
  0xec   :  { %443 = vsyncadd [#allocation4], 4294967264 }
  0xed   :  { %412 = vsyncpa [#allocation4], 1 }

</bundles_post_ra>
